<compile_context>
chip_gen: v7x
topology: tpu7x:2x2x1
jax: 0.10.0
libtpu: 0.0.40
codegen_flags: <defaults>
</compile_context>

<pallas_src>
import jax
import jax.numpy as jnp
from jax import lax
from jax.experimental import pallas as pl
from jax.experimental.pallas import tpu as pltpu

B, CIN, H, W = 10, 1, 10, 10
COUT, KH, KW = 16, 5, 5
OH, OW = H - KH + 1, W - KW + 1          # 6, 6
NCOL = B * OH * OW                       # 360 output columns (col = b*36 + oh*6 + ow)
NPAD = 384                               # padded to a multiple of 128 lanes


def _conv_kernel(p_ref, w_ref, o_ref):
    # p_ref: (KH*KW, NPAD)        im2col patches, lane-dense
    # w_ref: (KH*KW, COUT, NPAD)  per-output-column broadcast weights
    # o_ref: (COUT, NPAD)
    acc = [jnp.zeros((COUT, NPAD), jnp.float32) for _ in range(4)]
    for k in range(KH * KW):                         # statically unrolled: 25 dense FMAs
        acc[k % 4] = acc[k % 4] + w_ref[k] * p_ref[k]  # (16,384) * (384,) -> (16,384)
    o_ref[...] = ((acc[0] + acc[1]) + (acc[2] + acc[3])).astype(o_ref.dtype)


def cnn_forward(x, weight):
    """x: (10, 1, 10, 10) f32, weight: (10, 16, 1, 5, 5) f32 -> (10, 16, 6, 6) f32."""
    xs = x[:, 0]                                     # (B, H, W); Cin == 1

    # im2col in the wrapper: pat[k, b*36 + oh*6 + ow] = x[b, 0, oh+kh, ow+kw]
    pat = jnp.stack(
        [xs[:, kh:kh + OH, kw:kw + OW].reshape(B, OH * OW)
         for kh in range(KH) for kw in range(KW)],
        axis=0,
    ).reshape(KH * KW, NCOL)
    pat = jnp.pad(pat, ((0, 0), (0, NPAD - NCOL)))   # (25, 384)

    # Per-sample weights broadcast to one value per output column:
    # wcols[k, c, b*36 + p] = weight[b, c, 0, kh, kw]
    w25 = weight[:, :, 0].reshape(B, COUT, KH * KW).transpose(2, 1, 0)  # (25, 16, 10)
    wcols = jnp.repeat(w25, OH * OW, axis=2)                            # (25, 16, 360)
    wcols = jnp.pad(wcols, ((0, 0), (0, 0), (0, NPAD - NCOL)))          # (25, 16, 384)

    out_col = pl.pallas_call(
        _conv_kernel,
        out_shape=jax.ShapeDtypeStruct((COUT, NPAD), jnp.float32),
        in_specs=[
            pl.BlockSpec(memory_space=pltpu.MemorySpace.VMEM),
            pl.BlockSpec(memory_space=pltpu.MemorySpace.VMEM),
        ],
        out_specs=pl.BlockSpec(memory_space=pltpu.MemorySpace.VMEM),
    )(pat, wcols)                                    # (16, 384), lane-dense stores

    out = out_col[:, :NCOL].reshape(COUT, B, OH * OW)
    return out.transpose(1, 0, 2).reshape(B, COUT, OH, OW)


def cnn_reference(x, weight):
    """Plain-JAX reference matching the PyTorch forward."""
    def one(xi, wi):
        # xi: (1, 10, 10) -> (1, 1, 10, 10); wi: (16, 1, 5, 5)
        return lax.conv_general_dilated(
            xi[None], wi, window_strides=(1, 1), padding="VALID",
            dimension_numbers=("NCHW", "OIHW", "NCHW"))[0]
    return jax.vmap(one)(x, weight)


if __name__ == "__main__":
    key = jax.random.PRNGKey(0)
    kx, kw, kb = jax.random.split(key, 3)

    # Deterministic inputs / parameters (shapes fixed by the module).
    x = jax.random.normal(kx, (B, CIN, H, W), dtype=jnp.float32)
    weight = jax.random.normal(kw, (B, COUT, CIN, KH, KW), dtype=jnp.float32)
    bias = jax.random.normal(kb, (COUT,), dtype=jnp.float32)  # unused in forward (matches PyTorch)

    out = jax.jit(cnn_forward)(x, weight)
    out = jax.block_until_ready(out)

    ref = cnn_reference(x, weight)
    assert out.shape == (B, COUT, OH, OW) and out.dtype == jnp.float32
    assert jnp.allclose(out, ref, atol=1e-4, rtol=1e-4)

    print("KERNEL_OK")
</pallas_src>

<mosaic_0001>
module attributes {stable_mosaic.version = 11 : i64} {
  func.func @_conv_kernel(%arg0: memref<25x384xf32, #tpu.memory_space<vmem>>, %arg1: memref<25x16x384xf32, #tpu.memory_space<vmem>>, %arg2: memref<16x384xf32, #tpu.memory_space<vmem>>) attributes {dimension_semantics = [], scalar_prefetch = 0 : i64, scratch_operands = 0 : i64, tpu.core_type = #tpu.core_type<tc>} {
    %cst = arith.constant 0.000000e+00 : f32
    %0 = vector.broadcast %cst : f32 to vector<16x384xf32>
    %cst_0 = arith.constant 0.000000e+00 : f32
    %1 = vector.broadcast %cst_0 : f32 to vector<16x384xf32>
    %cst_1 = arith.constant 0.000000e+00 : f32
    %2 = vector.broadcast %cst_1 : f32 to vector<16x384xf32>
    %cst_2 = arith.constant 0.000000e+00 : f32
    %3 = vector.broadcast %cst_2 : f32 to vector<16x384xf32>
    %c0 = arith.constant 0 : index
    %c0_3 = arith.constant 0 : index
    %c0_4 = arith.constant 0 : index
    %4 = vector.load %arg1[%c0, %c0_3, %c0_4] : memref<25x16x384xf32, #tpu.memory_space<vmem>>, vector<1x16x384xf32>
    %5 = vector.shape_cast %4 : vector<1x16x384xf32> to vector<16x384xf32>
    %c0_5 = arith.constant 0 : index
    %c0_6 = arith.constant 0 : index
    %6 = vector.load %arg0[%c0_5, %c0_6] : memref<25x384xf32, #tpu.memory_space<vmem>>, vector<1x384xf32>
    %7 = vector.shape_cast %6 : vector<1x384xf32> to vector<384xf32>
    %8 = vector.shape_cast %7 : vector<384xf32> to vector<1x384xf32>
    %9 = vector.broadcast %8 : vector<1x384xf32> to vector<16x384xf32>
    %10 = arith.mulf %5, %9 : vector<16x384xf32>
    %11 = arith.addf %0, %10 : vector<16x384xf32>
    %c1 = arith.constant 1 : index
    %c0_7 = arith.constant 0 : index
    %c0_8 = arith.constant 0 : index
    %12 = vector.load %arg1[%c1, %c0_7, %c0_8] : memref<25x16x384xf32, #tpu.memory_space<vmem>>, vector<1x16x384xf32>
    %13 = vector.shape_cast %12 : vector<1x16x384xf32> to vector<16x384xf32>
    %c1_9 = arith.constant 1 : index
    %c0_10 = arith.constant 0 : index
    %14 = vector.load %arg0[%c1_9, %c0_10] : memref<25x384xf32, #tpu.memory_space<vmem>>, vector<1x384xf32>
    %15 = vector.shape_cast %14 : vector<1x384xf32> to vector<384xf32>
    %16 = vector.shape_cast %15 : vector<384xf32> to vector<1x384xf32>
    %17 = vector.broadcast %16 : vector<1x384xf32> to vector<16x384xf32>
    %18 = arith.mulf %13, %17 : vector<16x384xf32>
    %19 = arith.addf %1, %18 : vector<16x384xf32>
    %c2 = arith.constant 2 : index
    %c0_11 = arith.constant 0 : index
    %c0_12 = arith.constant 0 : index
    %20 = vector.load %arg1[%c2, %c0_11, %c0_12] : memref<25x16x384xf32, #tpu.memory_space<vmem>>, vector<1x16x384xf32>
    %21 = vector.shape_cast %20 : vector<1x16x384xf32> to vector<16x384xf32>
    %c2_13 = arith.constant 2 : index
    %c0_14 = arith.constant 0 : index
    %22 = vector.load %arg0[%c2_13, %c0_14] : memref<25x384xf32, #tpu.memory_space<vmem>>, vector<1x384xf32>
    %23 = vector.shape_cast %22 : vector<1x384xf32> to vector<384xf32>
    %24 = vector.shape_cast %23 : vector<384xf32> to vector<1x384xf32>
    %25 = vector.broadcast %24 : vector<1x384xf32> to vector<16x384xf32>
    %26 = arith.mulf %21, %25 : vector<16x384xf32>
    %27 = arith.addf %2, %26 : vector<16x384xf32>
    %c3 = arith.constant 3 : index
    %c0_15 = arith.constant 0 : index
    %c0_16 = arith.constant 0 : index
    %28 = vector.load %arg1[%c3, %c0_15, %c0_16] : memref<25x16x384xf32, #tpu.memory_space<vmem>>, vector<1x16x384xf32>
    %29 = vector.shape_cast %28 : vector<1x16x384xf32> to vector<16x384xf32>
    %c3_17 = arith.constant 3 : index
    %c0_18 = arith.constant 0 : index
    %30 = vector.load %arg0[%c3_17, %c0_18] : memref<25x384xf32, #tpu.memory_space<vmem>>, vector<1x384xf32>
    %31 = vector.shape_cast %30 : vector<1x384xf32> to vector<384xf32>
    %32 = vector.shape_cast %31 : vector<384xf32> to vector<1x384xf32>
    %33 = vector.broadcast %32 : vector<1x384xf32> to vector<16x384xf32>
    %34 = arith.mulf %29, %33 : vector<16x384xf32>
    %35 = arith.addf %3, %34 : vector<16x384xf32>
    %c4 = arith.constant 4 : index
    %c0_19 = arith.constant 0 : index
    %c0_20 = arith.constant 0 : index
    %36 = vector.load %arg1[%c4, %c0_19, %c0_20] : memref<25x16x384xf32, #tpu.memory_space<vmem>>, vector<1x16x384xf32>
    %37 = vector.shape_cast %36 : vector<1x16x384xf32> to vector<16x384xf32>
    %c4_21 = arith.constant 4 : index
    %c0_22 = arith.constant 0 : index
    %38 = vector.load %arg0[%c4_21, %c0_22] : memref<25x384xf32, #tpu.memory_space<vmem>>, vector<1x384xf32>
    %39 = vector.shape_cast %38 : vector<1x384xf32> to vector<384xf32>
    %40 = vector.shape_cast %39 : vector<384xf32> to vector<1x384xf32>
    %41 = vector.broadcast %40 : vector<1x384xf32> to vector<16x384xf32>
    %42 = arith.mulf %37, %41 : vector<16x384xf32>
    %43 = arith.addf %11, %42 : vector<16x384xf32>
    %c5 = arith.constant 5 : index
    %c0_23 = arith.constant 0 : index
    %c0_24 = arith.constant 0 : index
    %44 = vector.load %arg1[%c5, %c0_23, %c0_24] : memref<25x16x384xf32, #tpu.memory_space<vmem>>, vector<1x16x384xf32>
    %45 = vector.shape_cast %44 : vector<1x16x384xf32> to vector<16x384xf32>
    %c5_25 = arith.constant 5 : index
    %c0_26 = arith.constant 0 : index
    %46 = vector.load %arg0[%c5_25, %c0_26] : memref<25x384xf32, #tpu.memory_space<vmem>>, vector<1x384xf32>
    %47 = vector.shape_cast %46 : vector<1x384xf32> to vector<384xf32>
    %48 = vector.shape_cast %47 : vector<384xf32> to vector<1x384xf32>
    %49 = vector.broadcast %48 : vector<1x384xf32> to vector<16x384xf32>
    %50 = arith.mulf %45, %49 : vector<16x384xf32>
    %51 = arith.addf %19, %50 : vector<16x384xf32>
    %c6 = arith.constant 6 : index
    %c0_27 = arith.constant 0 : index
    %c0_28 = arith.constant 0 : index
    %52 = vector.load %arg1[%c6, %c0_27, %c0_28] : memref<25x16x384xf32, #tpu.memory_space<vmem>>, vector<1x16x384xf32>
    %53 = vector.shape_cast %52 : vector<1x16x384xf32> to vector<16x384xf32>
    %c6_29 = arith.constant 6 : index
    %c0_30 = arith.constant 0 : index
    %54 = vector.load %arg0[%c6_29, %c0_30] : memref<25x384xf32, #tpu.memory_space<vmem>>, vector<1x384xf32>
    %55 = vector.shape_cast %54 : vector<1x384xf32> to vector<384xf32>
    %56 = vector.shape_cast %55 : vector<384xf32> to vector<1x384xf32>
    %57 = vector.broadcast %56 : vector<1x384xf32> to vector<16x384xf32>
    %58 = arith.mulf %53, %57 : vector<16x384xf32>
    %59 = arith.addf %27, %58 : vector<16x384xf32>
    %c7 = arith.constant 7 : index
    %c0_31 = arith.constant 0 : index
    %c0_32 = arith.constant 0 : index
    %60 = vector.load %arg1[%c7, %c0_31, %c0_32] : memref<25x16x384xf32, #tpu.memory_space<vmem>>, vector<1x16x384xf32>
    %61 = vector.shape_cast %60 : vector<1x16x384xf32> to vector<16x384xf32>
    %c7_33 = arith.constant 7 : index
    %c0_34 = arith.constant 0 : index
    %62 = vector.load %arg0[%c7_33, %c0_34] : memref<25x384xf32, #tpu.memory_space<vmem>>, vector<1x384xf32>
    %63 = vector.shape_cast %62 : vector<1x384xf32> to vector<384xf32>
    %64 = vector.shape_cast %63 : vector<384xf32> to vector<1x384xf32>
    %65 = vector.broadcast %64 : vector<1x384xf32> to vector<16x384xf32>
    %66 = arith.mulf %61, %65 : vector<16x384xf32>
    %67 = arith.addf %35, %66 : vector<16x384xf32>
    %c8 = arith.constant 8 : index
    %c0_35 = arith.constant 0 : index
    %c0_36 = arith.constant 0 : index
    %68 = vector.load %arg1[%c8, %c0_35, %c0_36] : memref<25x16x384xf32, #tpu.memory_space<vmem>>, vector<1x16x384xf32>
    %69 = vector.shape_cast %68 : vector<1x16x384xf32> to vector<16x384xf32>
    %c8_37 = arith.constant 8 : index
    %c0_38 = arith.constant 0 : index
    %70 = vector.load %arg0[%c8_37, %c0_38] : memref<25x384xf32, #tpu.memory_space<vmem>>, vector<1x384xf32>
    %71 = vector.shape_cast %70 : vector<1x384xf32> to vector<384xf32>
    %72 = vector.shape_cast %71 : vector<384xf32> to vector<1x384xf32>
    %73 = vector.broadcast %72 : vector<1x384xf32> to vector<16x384xf32>
    %74 = arith.mulf %69, %73 : vector<16x384xf32>
    %75 = arith.addf %43, %74 : vector<16x384xf32>
    %c9 = arith.constant 9 : index
    %c0_39 = arith.constant 0 : index
    %c0_40 = arith.constant 0 : index
    %76 = vector.load %arg1[%c9, %c0_39, %c0_40] : memref<25x16x384xf32, #tpu.memory_space<vmem>>, vector<1x16x384xf32>
    %77 = vector.shape_cast %76 : vector<1x16x384xf32> to vector<16x384xf32>
    %c9_41 = arith.constant 9 : index
    %c0_42 = arith.constant 0 : index
    %78 = vector.load %arg0[%c9_41, %c0_42] : memref<25x384xf32, #tpu.memory_space<vmem>>, vector<1x384xf32>
    %79 = vector.shape_cast %78 : vector<1x384xf32> to vector<384xf32>
    %80 = vector.shape_cast %79 : vector<384xf32> to vector<1x384xf32>
    %81 = vector.broadcast %80 : vector<1x384xf32> to vector<16x384xf32>
    %82 = arith.mulf %77, %81 : vector<16x384xf32>
    %83 = arith.addf %51, %82 : vector<16x384xf32>
    %c10 = arith.constant 10 : index
    %c0_43 = arith.constant 0 : index
    %c0_44 = arith.constant 0 : index
    %84 = vector.load %arg1[%c10, %c0_43, %c0_44] : memref<25x16x384xf32, #tpu.memory_space<vmem>>, vector<1x16x384xf32>
    %85 = vector.shape_cast %84 : vector<1x16x384xf32> to vector<16x384xf32>
    %c10_45 = arith.constant 10 : index
    %c0_46 = arith.constant 0 : index
    %86 = vector.load %arg0[%c10_45, %c0_46] : memref<25x384xf32, #tpu.memory_space<vmem>>, vector<1x384xf32>
    %87 = vector.shape_cast %86 : vector<1x384xf32> to vector<384xf32>
    %88 = vector.shape_cast %87 : vector<384xf32> to vector<1x384xf32>
    %89 = vector.broadcast %88 : vector<1x384xf32> to vector<16x384xf32>
    %90 = arith.mulf %85, %89 : vector<16x384xf32>
    %91 = arith.addf %59, %90 : vector<16x384xf32>
    %c11 = arith.constant 11 : index
    %c0_47 = arith.constant 0 : index
    %c0_48 = arith.constant 0 : index
    %92 = vector.load %arg1[%c11, %c0_47, %c0_48] : memref<25x16x384xf32, #tpu.memory_space<vmem>>, vector<1x16x384xf32>
    %93 = vector.shape_cast %92 : vector<1x16x384xf32> to vector<16x384xf32>
    %c11_49 = arith.constant 11 : index
    %c0_50 = arith.constant 0 : index
    %94 = vector.load %arg0[%c11_49, %c0_50] : memref<25x384xf32, #tpu.memory_space<vmem>>, vector<1x384xf32>
    %95 = vector.shape_cast %94 : vector<1x384xf32> to vector<384xf32>
    %96 = vector.shape_cast %95 : vector<384xf32> to vector<1x384xf32>
    %97 = vector.broadcast %96 : vector<1x384xf32> to vector<16x384xf32>
    %98 = arith.mulf %93, %97 : vector<16x384xf32>
    %99 = arith.addf %67, %98 : vector<16x384xf32>
    %c12 = arith.constant 12 : index
    %c0_51 = arith.constant 0 : index
    %c0_52 = arith.constant 0 : index
    %100 = vector.load %arg1[%c12, %c0_51, %c0_52] : memref<25x16x384xf32, #tpu.memory_space<vmem>>, vector<1x16x384xf32>
    %101 = vector.shape_cast %100 : vector<1x16x384xf32> to vector<16x384xf32>
    %c12_53 = arith.constant 12 : index
    %c0_54 = arith.constant 0 : index
    %102 = vector.load %arg0[%c12_53, %c0_54] : memref<25x384xf32, #tpu.memory_space<vmem>>, vector<1x384xf32>
    %103 = vector.shape_cast %102 : vector<1x384xf32> to vector<384xf32>
    %104 = vector.shape_cast %103 : vector<384xf32> to vector<1x384xf32>
    %105 = vector.broadcast %104 : vector<1x384xf32> to vector<16x384xf32>
    %106 = arith.mulf %101, %105 : vector<16x384xf32>
    %107 = arith.addf %75, %106 : vector<16x384xf32>
    %c13 = arith.constant 13 : index
    %c0_55 = arith.constant 0 : index
    %c0_56 = arith.constant 0 : index
    %108 = vector.load %arg1[%c13, %c0_55, %c0_56] : memref<25x16x384xf32, #tpu.memory_space<vmem>>, vector<1x16x384xf32>
    %109 = vector.shape_cast %108 : vector<1x16x384xf32> to vector<16x384xf32>
    %c13_57 = arith.constant 13 : index
    %c0_58 = arith.constant 0 : index
    %110 = vector.load %arg0[%c13_57, %c0_58] : memref<25x384xf32, #tpu.memory_space<vmem>>, vector<1x384xf32>
    %111 = vector.shape_cast %110 : vector<1x384xf32> to vector<384xf32>
    %112 = vector.shape_cast %111 : vector<384xf32> to vector<1x384xf32>
    %113 = vector.broadcast %112 : vector<1x384xf32> to vector<16x384xf32>
    %114 = arith.mulf %109, %113 : vector<16x384xf32>
    %115 = arith.addf %83, %114 : vector<16x384xf32>
    %c14 = arith.constant 14 : index
    %c0_59 = arith.constant 0 : index
    %c0_60 = arith.constant 0 : index
    %116 = vector.load %arg1[%c14, %c0_59, %c0_60] : memref<25x16x384xf32, #tpu.memory_space<vmem>>, vector<1x16x384xf32>
    %117 = vector.shape_cast %116 : vector<1x16x384xf32> to vector<16x384xf32>
    %c14_61 = arith.constant 14 : index
    %c0_62 = arith.constant 0 : index
    %118 = vector.load %arg0[%c14_61, %c0_62] : memref<25x384xf32, #tpu.memory_space<vmem>>, vector<1x384xf32>
    %119 = vector.shape_cast %118 : vector<1x384xf32> to vector<384xf32>
    %120 = vector.shape_cast %119 : vector<384xf32> to vector<1x384xf32>
    %121 = vector.broadcast %120 : vector<1x384xf32> to vector<16x384xf32>
    %122 = arith.mulf %117, %121 : vector<16x384xf32>
    %123 = arith.addf %91, %122 : vector<16x384xf32>
    %c15 = arith.constant 15 : index
    %c0_63 = arith.constant 0 : index
    %c0_64 = arith.constant 0 : index
    %124 = vector.load %arg1[%c15, %c0_63, %c0_64] : memref<25x16x384xf32, #tpu.memory_space<vmem>>, vector<1x16x384xf32>
    %125 = vector.shape_cast %124 : vector<1x16x384xf32> to vector<16x384xf32>
    %c15_65 = arith.constant 15 : index
    %c0_66 = arith.constant 0 : index
    %126 = vector.load %arg0[%c15_65, %c0_66] : memref<25x384xf32, #tpu.memory_space<vmem>>, vector<1x384xf32>
    %127 = vector.shape_cast %126 : vector<1x384xf32> to vector<384xf32>
    %128 = vector.shape_cast %127 : vector<384xf32> to vector<1x384xf32>
    %129 = vector.broadcast %128 : vector<1x384xf32> to vector<16x384xf32>
    %130 = arith.mulf %125, %129 : vector<16x384xf32>
    %131 = arith.addf %99, %130 : vector<16x384xf32>
    %c16 = arith.constant 16 : index
    %c0_67 = arith.constant 0 : index
    %c0_68 = arith.constant 0 : index
    %132 = vector.load %arg1[%c16, %c0_67, %c0_68] : memref<25x16x384xf32, #tpu.memory_space<vmem>>, vector<1x16x384xf32>
    %133 = vector.shape_cast %132 : vector<1x16x384xf32> to vector<16x384xf32>
    %c16_69 = arith.constant 16 : index
    %c0_70 = arith.constant 0 : index
    %134 = vector.load %arg0[%c16_69, %c0_70] : memref<25x384xf32, #tpu.memory_space<vmem>>, vector<1x384xf32>
    %135 = vector.shape_cast %134 : vector<1x384xf32> to vector<384xf32>
    %136 = vector.shape_cast %135 : vector<384xf32> to vector<1x384xf32>
    %137 = vector.broadcast %136 : vector<1x384xf32> to vector<16x384xf32>
    %138 = arith.mulf %133, %137 : vector<16x384xf32>
    %139 = arith.addf %107, %138 : vector<16x384xf32>
    %c17 = arith.constant 17 : index
    %c0_71 = arith.constant 0 : index
    %c0_72 = arith.constant 0 : index
    %140 = vector.load %arg1[%c17, %c0_71, %c0_72] : memref<25x16x384xf32, #tpu.memory_space<vmem>>, vector<1x16x384xf32>
    %141 = vector.shape_cast %140 : vector<1x16x384xf32> to vector<16x384xf32>
    %c17_73 = arith.constant 17 : index
    %c0_74 = arith.constant 0 : index
    %142 = vector.load %arg0[%c17_73, %c0_74] : memref<25x384xf32, #tpu.memory_space<vmem>>, vector<1x384xf32>
    %143 = vector.shape_cast %142 : vector<1x384xf32> to vector<384xf32>
    %144 = vector.shape_cast %143 : vector<384xf32> to vector<1x384xf32>
    %145 = vector.broadcast %144 : vector<1x384xf32> to vector<16x384xf32>
    %146 = arith.mulf %141, %145 : vector<16x384xf32>
    %147 = arith.addf %115, %146 : vector<16x384xf32>
    %c18 = arith.constant 18 : index
    %c0_75 = arith.constant 0 : index
    %c0_76 = arith.constant 0 : index
    %148 = vector.load %arg1[%c18, %c0_75, %c0_76] : memref<25x16x384xf32, #tpu.memory_space<vmem>>, vector<1x16x384xf32>
    %149 = vector.shape_cast %148 : vector<1x16x384xf32> to vector<16x384xf32>
    %c18_77 = arith.constant 18 : index
    %c0_78 = arith.constant 0 : index
    %150 = vector.load %arg0[%c18_77, %c0_78] : memref<25x384xf32, #tpu.memory_space<vmem>>, vector<1x384xf32>
    %151 = vector.shape_cast %150 : vector<1x384xf32> to vector<384xf32>
    %152 = vector.shape_cast %151 : vector<384xf32> to vector<1x384xf32>
    %153 = vector.broadcast %152 : vector<1x384xf32> to vector<16x384xf32>
    %154 = arith.mulf %149, %153 : vector<16x384xf32>
    %155 = arith.addf %123, %154 : vector<16x384xf32>
    %c19 = arith.constant 19 : index
    %c0_79 = arith.constant 0 : index
    %c0_80 = arith.constant 0 : index
    %156 = vector.load %arg1[%c19, %c0_79, %c0_80] : memref<25x16x384xf32, #tpu.memory_space<vmem>>, vector<1x16x384xf32>
    %157 = vector.shape_cast %156 : vector<1x16x384xf32> to vector<16x384xf32>
    %c19_81 = arith.constant 19 : index
    %c0_82 = arith.constant 0 : index
    %158 = vector.load %arg0[%c19_81, %c0_82] : memref<25x384xf32, #tpu.memory_space<vmem>>, vector<1x384xf32>
    %159 = vector.shape_cast %158 : vector<1x384xf32> to vector<384xf32>
    %160 = vector.shape_cast %159 : vector<384xf32> to vector<1x384xf32>
    %161 = vector.broadcast %160 : vector<1x384xf32> to vector<16x384xf32>
    %162 = arith.mulf %157, %161 : vector<16x384xf32>
    %163 = arith.addf %131, %162 : vector<16x384xf32>
    %c20 = arith.constant 20 : index
    %c0_83 = arith.constant 0 : index
    %c0_84 = arith.constant 0 : index
    %164 = vector.load %arg1[%c20, %c0_83, %c0_84] : memref<25x16x384xf32, #tpu.memory_space<vmem>>, vector<1x16x384xf32>
    %165 = vector.shape_cast %164 : vector<1x16x384xf32> to vector<16x384xf32>
    %c20_85 = arith.constant 20 : index
    %c0_86 = arith.constant 0 : index
    %166 = vector.load %arg0[%c20_85, %c0_86] : memref<25x384xf32, #tpu.memory_space<vmem>>, vector<1x384xf32>
    %167 = vector.shape_cast %166 : vector<1x384xf32> to vector<384xf32>
    %168 = vector.shape_cast %167 : vector<384xf32> to vector<1x384xf32>
    %169 = vector.broadcast %168 : vector<1x384xf32> to vector<16x384xf32>
    %170 = arith.mulf %165, %169 : vector<16x384xf32>
    %171 = arith.addf %139, %170 : vector<16x384xf32>
    %c21 = arith.constant 21 : index
    %c0_87 = arith.constant 0 : index
    %c0_88 = arith.constant 0 : index
    %172 = vector.load %arg1[%c21, %c0_87, %c0_88] : memref<25x16x384xf32, #tpu.memory_space<vmem>>, vector<1x16x384xf32>
    %173 = vector.shape_cast %172 : vector<1x16x384xf32> to vector<16x384xf32>
    %c21_89 = arith.constant 21 : index
    %c0_90 = arith.constant 0 : index
    %174 = vector.load %arg0[%c21_89, %c0_90] : memref<25x384xf32, #tpu.memory_space<vmem>>, vector<1x384xf32>
    %175 = vector.shape_cast %174 : vector<1x384xf32> to vector<384xf32>
    %176 = vector.shape_cast %175 : vector<384xf32> to vector<1x384xf32>
    %177 = vector.broadcast %176 : vector<1x384xf32> to vector<16x384xf32>
    %178 = arith.mulf %173, %177 : vector<16x384xf32>
    %179 = arith.addf %147, %178 : vector<16x384xf32>
    %c22 = arith.constant 22 : index
    %c0_91 = arith.constant 0 : index
    %c0_92 = arith.constant 0 : index
    %180 = vector.load %arg1[%c22, %c0_91, %c0_92] : memref<25x16x384xf32, #tpu.memory_space<vmem>>, vector<1x16x384xf32>
    %181 = vector.shape_cast %180 : vector<1x16x384xf32> to vector<16x384xf32>
    %c22_93 = arith.constant 22 : index
    %c0_94 = arith.constant 0 : index
    %182 = vector.load %arg0[%c22_93, %c0_94] : memref<25x384xf32, #tpu.memory_space<vmem>>, vector<1x384xf32>
    %183 = vector.shape_cast %182 : vector<1x384xf32> to vector<384xf32>
    %184 = vector.shape_cast %183 : vector<384xf32> to vector<1x384xf32>
    %185 = vector.broadcast %184 : vector<1x384xf32> to vector<16x384xf32>
    %186 = arith.mulf %181, %185 : vector<16x384xf32>
    %187 = arith.addf %155, %186 : vector<16x384xf32>
    %c23 = arith.constant 23 : index
    %c0_95 = arith.constant 0 : index
    %c0_96 = arith.constant 0 : index
    %188 = vector.load %arg1[%c23, %c0_95, %c0_96] : memref<25x16x384xf32, #tpu.memory_space<vmem>>, vector<1x16x384xf32>
    %189 = vector.shape_cast %188 : vector<1x16x384xf32> to vector<16x384xf32>
    %c23_97 = arith.constant 23 : index
    %c0_98 = arith.constant 0 : index
    %190 = vector.load %arg0[%c23_97, %c0_98] : memref<25x384xf32, #tpu.memory_space<vmem>>, vector<1x384xf32>
    %191 = vector.shape_cast %190 : vector<1x384xf32> to vector<384xf32>
    %192 = vector.shape_cast %191 : vector<384xf32> to vector<1x384xf32>
    %193 = vector.broadcast %192 : vector<1x384xf32> to vector<16x384xf32>
    %194 = arith.mulf %189, %193 : vector<16x384xf32>
    %195 = arith.addf %163, %194 : vector<16x384xf32>
    %c24 = arith.constant 24 : index
    %c0_99 = arith.constant 0 : index
    %c0_100 = arith.constant 0 : index
    %196 = vector.load %arg1[%c24, %c0_99, %c0_100] : memref<25x16x384xf32, #tpu.memory_space<vmem>>, vector<1x16x384xf32>
    %197 = vector.shape_cast %196 : vector<1x16x384xf32> to vector<16x384xf32>
    %c24_101 = arith.constant 24 : index
    %c0_102 = arith.constant 0 : index
    %198 = vector.load %arg0[%c24_101, %c0_102] : memref<25x384xf32, #tpu.memory_space<vmem>>, vector<1x384xf32>
    %199 = vector.shape_cast %198 : vector<1x384xf32> to vector<384xf32>
    %200 = vector.shape_cast %199 : vector<384xf32> to vector<1x384xf32>
    %201 = vector.broadcast %200 : vector<1x384xf32> to vector<16x384xf32>
    %202 = arith.mulf %197, %201 : vector<16x384xf32>
    %203 = arith.addf %171, %202 : vector<16x384xf32>
    %204 = arith.addf %203, %179 : vector<16x384xf32>
    %205 = arith.addf %187, %195 : vector<16x384xf32>
    %206 = arith.addf %204, %205 : vector<16x384xf32>
    %c0_103 = arith.constant 0 : index
    %c0_104 = arith.constant 0 : index
    %207 = vector.load %arg2[%c0_103, %c0_104] : memref<16x384xf32, #tpu.memory_space<vmem>>, vector<16x384xf32>
    tpu.vector_store %arg2[%c0_103, %c0_104], %206 {strides = array<i32>} : memref<16x384xf32, #tpu.memory_space<vmem>>, vector<16x384xf32>,
    return
  }
}

</mosaic_0001>

<bundles_post_ra>
// kernel: squeeze.3
= control target key start
LH: loop header
LB: loop body
LE: loop exit
PB: predicated region body
PF: predicated region fallthrough
CT: control target
= control target key end

     0   :  { %vm3_vm0 = vcmask 130048   ;;  %s708_s0 = inlined_call_operand.vmem [shape: f32[10,16,5,5], index: 0, kind: input, shape index: {}]   ;;  %s709_s1 = inlined_call_operand.vmem [shape: f32[10,16,25], index: 1, kind: output, shape index: {}]  }
   0x1   :  { %v2_v0 = vld [vmem:[%s708_s0] sm:$0x1f]   ;;  %v250_v1 = vld [vmem:[%s708_s0 + $0x8] sm:$0x1f]   ;;  %v252_v2 = vld [vmem:[%s708_s0 + $0x10] sm:$0x1f]  }
   0x2   :  { %4 = vst.msk [vmem:[%s709_s1] sm:$0x1f] %vm3_vm0, %v2_v0   ;;  %251 = vst.msk [vmem:[%s709_s1 + $0x5] sm:$0x1f] %vm3_vm0, %v250_v1   ;;  %v254_v3 = vld [vmem:[%s708_s0 + $0x18] sm:$0x1f]  }
   0x3   :  { %253 = vst.msk [vmem:[%s709_s1 + $0xa] sm:$0x1f] %vm3_vm0, %v252_v2   ;;  %v256_v4 = vld [vmem:[%s708_s0 + $0x20] sm:$0x1f]   ;;  %v258_v5 = vld [vmem:[%s708_s0 + $0x28] sm:$0x1f]  }
   0x4   :  { %255 = vst.msk [vmem:[%s709_s1 + $0xf] sm:$0x1f] %vm3_vm0, %v254_v3   ;;  %257 = vst.msk [vmem:[%s709_s1 + $0x14] sm:$0x1f] %vm3_vm0, %v256_v4   ;;  %v260_v6 = vld [vmem:[%s708_s0 + $0x30] sm:$0x1f]  }
   0x5   :  { %259 = vst.msk [vmem:[%s709_s1 + $0x20] sm:$0x1f] %vm3_vm0, %v258_v5   ;;  %v262_v7 = vld [vmem:[%s708_s0 + $0x38] sm:$0x1f]   ;;  %v264_v8 = vld [vmem:[%s708_s0 + $0x40] sm:$0x1f]  }
   0x6   :  { %261 = vst.msk [vmem:[%s709_s1 + $0x25] sm:$0x1f] %vm3_vm0, %v260_v6   ;;  %263 = vst.msk [vmem:[%s709_s1 + $0x2a] sm:$0x1f] %vm3_vm0, %v262_v7   ;;  %v266_v9 = vld [vmem:[%s708_s0 + $0x48] sm:$0x1f]  }
   0x7   :  { %265 = vst.msk [vmem:[%s709_s1 + $0x2f] sm:$0x1f] %vm3_vm0, %v264_v8   ;;  %v268_v10 = vld [vmem:[%s708_s0 + $0x50] sm:$0x1f]   ;;  %v270_v11 = vld [vmem:[%s708_s0 + $0x58] sm:$0x1f]  }
   0x8   :  { %267 = vst.msk [vmem:[%s709_s1 + $0x34] sm:$0x1f] %vm3_vm0, %v266_v9   ;;  %269 = vst.msk [vmem:[%s709_s1 + $0x40] sm:$0x1f] %vm3_vm0, %v268_v10   ;;  %v272_v12 = vld [vmem:[%s708_s0 + $0x60] sm:$0x1f]  }
   0x9   :  { %271 = vst.msk [vmem:[%s709_s1 + $0x45] sm:$0x1f] %vm3_vm0, %v270_v11   ;;  %v274_v13 = vld [vmem:[%s708_s0 + $0x68] sm:$0x1f]   ;;  %v276_v14 = vld [vmem:[%s708_s0 + $0x70] sm:$0x1f]  }
   0xa   :  { %273 = vst.msk [vmem:[%s709_s1 + $0x4a] sm:$0x1f] %vm3_vm0, %v272_v12   ;;  %275 = vst.msk [vmem:[%s709_s1 + $0x4f] sm:$0x1f] %vm3_vm0, %v274_v13   ;;  %v278_v15 = vld [vmem:[%s708_s0 + $0x78] sm:$0x1f]  }
   0xb   :  { %277 = vst.msk [vmem:[%s709_s1 + $0x54] sm:$0x1f] %vm3_vm0, %v276_v14   ;;  %v280_v16 = vld [vmem:[%s708_s0 + $0x80] sm:$0x1f]   ;;  %v282_v17 = vld [vmem:[%s708_s0 + $0x88] sm:$0x1f]  }
   0xc   :  { %279 = vst.msk [vmem:[%s709_s1 + $0x60] sm:$0x1f] %vm3_vm0, %v278_v15   ;;  %281 = vst.msk [vmem:[%s709_s1 + $0x65] sm:$0x1f] %vm3_vm0, %v280_v16   ;;  %v284_v18 = vld [vmem:[%s708_s0 + $0x90] sm:$0x1f]  }
   0xd   :  { %283 = vst.msk [vmem:[%s709_s1 + $0x6a] sm:$0x1f] %vm3_vm0, %v282_v17   ;;  %v286_v19 = vld [vmem:[%s708_s0 + $0x98] sm:$0x1f]   ;;  %v288_v20 = vld [vmem:[%s708_s0 + $0xa0] sm:$0x1f]  }
   0xe   :  { %285 = vst.msk [vmem:[%s709_s1 + $0x6f] sm:$0x1f] %vm3_vm0, %v284_v18   ;;  %287 = vst.msk [vmem:[%s709_s1 + $0x74] sm:$0x1f] %vm3_vm0, %v286_v19   ;;  %v290_v21 = vld [vmem:[%s708_s0 + $0xa8] sm:$0x1f]  }
   0xf   :  { %289 = vst.msk [vmem:[%s709_s1 + $0x80] sm:$0x1f] %vm3_vm0, %v288_v20   ;;  %v292_v22 = vld [vmem:[%s708_s0 + $0xb0] sm:$0x1f]   ;;  %v294_v23 = vld [vmem:[%s708_s0 + $0xb8] sm:$0x1f]  }
  0x10   :  { %291 = vst.msk [vmem:[%s709_s1 + $0x85] sm:$0x1f] %vm3_vm0, %v290_v21   ;;  %293 = vst.msk [vmem:[%s709_s1 + $0x8a] sm:$0x1f] %vm3_vm0, %v292_v22   ;;  %v296_v24 = vld [vmem:[%s708_s0 + $0xc0] sm:$0x1f]  }
  0x11   :  { %295 = vst.msk [vmem:[%s709_s1 + $0x8f] sm:$0x1f] %vm3_vm0, %v294_v23   ;;  %v298_v25 = vld [vmem:[%s708_s0 + $0xc8] sm:$0x1f]   ;;  %v300_v26 = vld [vmem:[%s708_s0 + $0xd0] sm:$0x1f]  }
  0x12   :  { %297 = vst.msk [vmem:[%s709_s1 + $0x94] sm:$0x1f] %vm3_vm0, %v296_v24   ;;  %299 = vst.msk [vmem:[%s709_s1 + $0xa0] sm:$0x1f] %vm3_vm0, %v298_v25   ;;  %v302_v27 = vld [vmem:[%s708_s0 + $0xd8] sm:$0x1f]  }
  0x13   :  { %301 = vst.msk [vmem:[%s709_s1 + $0xa5] sm:$0x1f] %vm3_vm0, %v300_v26   ;;  %v304_v28 = vld [vmem:[%s708_s0 + $0xe0] sm:$0x1f]   ;;  %v306_v29 = vld [vmem:[%s708_s0 + $0xe8] sm:$0x1f]  }
  0x14   :  { %303 = vst.msk [vmem:[%s709_s1 + $0xaa] sm:$0x1f] %vm3_vm0, %v302_v27   ;;  %305 = vst.msk [vmem:[%s709_s1 + $0xaf] sm:$0x1f] %vm3_vm0, %v304_v28   ;;  %v308_v30 = vld [vmem:[%s708_s0 + $0xf0] sm:$0x1f]  }
  0x15   :  { %307 = vst.msk [vmem:[%s709_s1 + $0xb4] sm:$0x1f] %vm3_vm0, %v306_v29   ;;  %v310_v31 = vld [vmem:[%s708_s0 + $0xf8] sm:$0x1f]   ;;  %v312_v32 = vld [vmem:[%s708_s0 + $0x100] sm:$0x1f]  }
  0x16   :  { %309 = vst.msk [vmem:[%s709_s1 + $0xc0] sm:$0x1f] %vm3_vm0, %v308_v30   ;;  %311 = vst.msk [vmem:[%s709_s1 + $0xc5] sm:$0x1f] %vm3_vm0, %v310_v31   ;;  %v314_v33 = vld [vmem:[%s708_s0 + $0x108] sm:$0x1f]  }
  0x17   :  { %313 = vst.msk [vmem:[%s709_s1 + $0xca] sm:$0x1f] %vm3_vm0, %v312_v32   ;;  %v316_v34 = vld [vmem:[%s708_s0 + $0x110] sm:$0x1f]   ;;  %v318_v35 = vld [vmem:[%s708_s0 + $0x118] sm:$0x1f]  }
  0x18   :  { %315 = vst.msk [vmem:[%s709_s1 + $0xcf] sm:$0x1f] %vm3_vm0, %v314_v33   ;;  %317 = vst.msk [vmem:[%s709_s1 + $0xd4] sm:$0x1f] %vm3_vm0, %v316_v34   ;;  %v320_v36 = vld [vmem:[%s708_s0 + $0x120] sm:$0x1f]  }
  0x19   :  { %319 = vst.msk [vmem:[%s709_s1 + $0xe0] sm:$0x1f] %vm3_vm0, %v318_v35   ;;  %v322_v37 = vld [vmem:[%s708_s0 + $0x128] sm:$0x1f]   ;;  %v324_v38 = vld [vmem:[%s708_s0 + $0x130] sm:$0x1f]  }
  0x1a   :  { %321 = vst.msk [vmem:[%s709_s1 + $0xe5] sm:$0x1f] %vm3_vm0, %v320_v36   ;;  %323 = vst.msk [vmem:[%s709_s1 + $0xea] sm:$0x1f] %vm3_vm0, %v322_v37   ;;  %v326_v39 = vld [vmem:[%s708_s0 + $0x138] sm:$0x1f]  }
  0x1b   :  { %325 = vst.msk [vmem:[%s709_s1 + $0xef] sm:$0x1f] %vm3_vm0, %v324_v38   ;;  %v328_v40 = vld [vmem:[%s708_s0 + $0x140] sm:$0x1f]   ;;  %v330_v41 = vld [vmem:[%s708_s0 + $0x148] sm:$0x1f]  }
  0x1c   :  { %327 = vst.msk [vmem:[%s709_s1 + $0xf4] sm:$0x1f] %vm3_vm0, %v326_v39   ;;  %329 = vst.msk [vmem:[%s709_s1 + $0x100] sm:$0x1f] %vm3_vm0, %v328_v40   ;;  %v332_v42 = vld [vmem:[%s708_s0 + $0x150] sm:$0x1f]  }
  0x1d   :  { %331 = vst.msk [vmem:[%s709_s1 + $0x105] sm:$0x1f] %vm3_vm0, %v330_v41   ;;  %v334_v43 = vld [vmem:[%s708_s0 + $0x158] sm:$0x1f]   ;;  %v336_v44 = vld [vmem:[%s708_s0 + $0x160] sm:$0x1f]  }
  0x1e   :  { %333 = vst.msk [vmem:[%s709_s1 + $0x10a] sm:$0x1f] %vm3_vm0, %v332_v42   ;;  %335 = vst.msk [vmem:[%s709_s1 + $0x10f] sm:$0x1f] %vm3_vm0, %v334_v43   ;;  %v338_v45 = vld [vmem:[%s708_s0 + $0x168] sm:$0x1f]  }
  0x1f   :  { %337 = vst.msk [vmem:[%s709_s1 + $0x114] sm:$0x1f] %vm3_vm0, %v336_v44   ;;  %v340_v46 = vld [vmem:[%s708_s0 + $0x170] sm:$0x1f]   ;;  %v342_v47 = vld [vmem:[%s708_s0 + $0x178] sm:$0x1f]  }
  0x20   :  { %339 = vst.msk [vmem:[%s709_s1 + $0x120] sm:$0x1f] %vm3_vm0, %v338_v45   ;;  %341 = vst.msk [vmem:[%s709_s1 + $0x125] sm:$0x1f] %vm3_vm0, %v340_v46   ;;  %v344_v48 = vld [vmem:[%s708_s0 + $0x180] sm:$0x1f]  }
  0x21   :  { %343 = vst.msk [vmem:[%s709_s1 + $0x12a] sm:$0x1f] %vm3_vm0, %v342_v47   ;;  %v346_v49 = vld [vmem:[%s708_s0 + $0x188] sm:$0x1f]   ;;  %345 = vst.msk [vmem:[%s709_s1 + $0x12f] sm:$0x1f] %vm3_vm0, %v344_v48  }
  0x22   :  { %347 = vst.msk [vmem:[%s709_s1 + $0x134] sm:$0x1f] %vm3_vm0, %v346_v49  }

// kernel: cnn_forward.1
= control target key start
LH: loop header
LB: loop body
LE: loop exit
PB: predicated region body
PF: predicated region fallthrough
CT: control target
= control target key end

     0   :  { %v19_v0 = vlaneseq  ;;  %s2165_s0 = inlined_call_operand.vmem [shape: f32[25,384], index: 0, kind: input, shape index: {}]   ;;  %s2166_s1 = inlined_call_operand.vmem [shape: f32[25,16,384], index: 1, kind: input, shape index: {}]   ;;  %s2167_s2 = inlined_call_operand.vmem [shape: f32[16,384], index: 2, kind: output, shape index: {}]  }
   0x1   :  { %v17_v2 = vld [vmem:[%s2165_s0] ss:$8 sm:$0x7]  ;;  %v968_v9 = vld [vmem:[%s2165_s0 + $0x1] ss:$8 sm:$0x7] }
   0x2   :  { %v20_v1 = vshrl.u32 %v19_v0, 7  ;;  %v11_v3 = vld [vmem:[%s2166_s1] sm:$0xff]  ;;  %v12_v7 = vld [vmem:[%s2166_s1 + $0x8] sm:$0xff]  ;;  %v13_v8 = vld [vmem:[%s2166_s1 + $0x10] sm:$0xff] }
   0x3   :  { %v14_v10 = vld [vmem:[%s2166_s1 + $0x18] sm:$0xff]  ;;  %v15_v11 = vld [vmem:[%s2166_s1 + $0x20] sm:$0xff]  ;;  %v16_v12 = vld [vmem:[%s2166_s1 + $0x28] sm:$0xff] }
   0x4   :  { %v1151_v4 = vsub.s32 0, %v20_v1  ;;  %v1153_v5 = vsub.s32 1, %v20_v1  ;;  %v1155_v6 = vsub.s32 2, %v20_v1  ;;  %v962_v17 = vld [vmem:[%s2166_s1 + $0x30] sm:$0xff]  ;;  %v963_v18 = vld [vmem:[%s2166_s1 + $0x38] sm:$0xff]  ;;  %v964_v19 = vld [vmem:[%s2166_s1 + $0x40] sm:$0xff] }
   0x5   :  { %v965_v21 = vld [vmem:[%s2166_s1 + $0x48] sm:$0xff]  ;;  %v966_v22 = vld [vmem:[%s2166_s1 + $0x50] sm:$0xff]  ;;  %v967_v29 = vld [vmem:[%s2166_s1 + $0x58] sm:$0xff] }
   0x6   :  { %v22_v13 = vrot.slane %v17_v2, %v1151_v4  ;;  %v26_v14 = vrot.slane %v17_v2, %v1153_v5  ;;  %v30_v15 = vrot.slane %v17_v2, %v1155_v6  ;;  %v59_v16 = vrot.slane %v968_v9, %v1151_v4  ;;  %v975_v24 = vld [vmem:[%s2165_s0 + $0x2] ss:$8 sm:$0x7]  ;;  %v972_v37 = vld [vmem:[%s2166_s1 + $0x78] sm:$0xff] }
   0x7   :  { %v63_v20 = vrot.slane %v968_v9, %v1153_v5  ;;  %v67_v23 = vrot.slane %v968_v9, %v1155_v6  ;;  %v969_v30 = vld [vmem:[%s2166_s1 + $0x60] sm:$0xff]  ;;  %v970_v31 = vld [vmem:[%s2166_s1 + $0x68] sm:$0xff]  ;;  %v971_v36 = vld [vmem:[%s2166_s1 + $0x70] sm:$0xff]  ;;  %v96_v41 = vrot.slane %v975_v24, %v1151_v4  ;;  %v100_v42 = vrot.slane %v975_v24, %v1153_v5 }
   0x8   :  { %v1199_v25 = vmul.f32 %v22_v13, %v11_v3  ;;  %v1201_v26 = vmul.f32 %v26_v14, %v12_v7  ;;  %v1203_v27 = vmul.f32 %v30_v15, %v13_v8  ;;  %v1205_v28 = vmul.f32 %v22_v13, %v14_v10  ;;  %v982_v38 = vld [vmem:[%s2165_s0 + $0x3] ss:$8 sm:$0x7]  ;;  %v977_v48 = vld [vmem:[%s2166_s1 + $0x98] sm:$0xff] }
   0x9   :  { %v1216_v32 = vmul.f32 %v26_v14, %v15_v11  ;;  %v1218_v33 = vmul.f32 %v30_v15, %v16_v12  ;;  %v1220_v34 = vmul.f32 %v962_v17, %v59_v16  ;;  %v1222_v35 = vmul.f32 %v963_v18, %v63_v20  ;;  %v973_v39 = vld [vmem:[%s2166_s1 + $0x80] sm:$0xff]  ;;  %v974_v40 = vld [vmem:[%s2166_s1 + $0x88] sm:$0xff]  ;;  %v976_v44 = vld [vmem:[%s2166_s1 + $0x90] sm:$0xff] }
   0xa   :  { %v104_v43 = vrot.slane %v975_v24, %v1155_v6  ;;  %v133_v45 = vrot.slane %v982_v38, %v1151_v4  ;;  %v1246_v46 = vmul.f32 %v964_v19, %v67_v23  ;;  %v1248_v47 = vmul.f32 %v965_v21, %v59_v16  ;;  %v978_v49 = vld [vmem:[%s2166_s1 + $0xa0] sm:$0xff]  ;;  %v979_v50 = vld [vmem:[%s2166_s1 + $0xa8] sm:$0xff]  ;;  %v980_v57 = vld [vmem:[%s2166_s1 + $0xb0] sm:$0xff] }
   0xb   :  { %v137_v51 = vrot.slane %v982_v38, %v1153_v5  ;;  %v141_v52 = vrot.slane %v982_v38, %v1155_v6  ;;  %v1261_v53 = vmul.f32 %v966_v22, %v63_v20  ;;  %v1263_v54 = vmul.f32 %v967_v29, %v67_v23  ;;  %v981_v58 = vld [vmem:[%s2166_s1 + $0xb8] sm:$0xff]  ;;  %v989_v59 = vld [vmem:[%s2165_s0 + $0x4] ss:$8 sm:$0x7] }
   0xc   :  { %v1265_v55 = vmul.f32 %v969_v30, %v96_v41  ;;  %v1267_v56 = vmul.f32 %v970_v31, %v100_v42  ;;  %v1278_v60 = vmul.f32 %v971_v36, %v104_v43  ;;  %v1280_v61 = vmul.f32 %v972_v37, %v96_v41  ;;  %v983_v0 = vld [vmem:[%s2166_s1 + $0xc0] sm:$0xff]  ;;  %v984_v1 = vld [vmem:[%s2166_s1 + $0xc8] sm:$0xff]  ;;  %v985_v10 = vld [vmem:[%s2166_s1 + $0xd0] sm:$0xff] }
   0xd   :  { %v1282_v62 = vmul.f32 %v973_v39, %v100_v42  ;;  %v1284_v63 = vmul.f32 %v974_v40, %v104_v43  ;;  %v996_v2 = vld [vmem:[%s2165_s0 + $0x5] ss:$8 sm:$0x7]  ;;  %v1295_v3 = vmul.f32 %v976_v44, %v133_v45  ;;  %v1297_v7 = vmul.f32 %v977_v48, %v137_v51  ;;  %v986_v11 = vld [vmem:[%s2166_s1 + $0xd8] sm:$0xff] }
   0xe   :  { %v1299_v8 = vmul.f32 %v978_v49, %v141_v52  ;;  %v1301_v9 = vmul.f32 %v979_v50, %v133_v45  ;;  %v987_v12 = vld [vmem:[%s2166_s1 + $0xe0] sm:$0xff]  ;;  %v988_v13 = vld [vmem:[%s2166_s1 + $0xe8] sm:$0xff]  ;;  %v170_v14 = vrot.slane %v989_v59, %v1151_v4  ;;  %v174_v15 = vrot.slane %v989_v59, %v1153_v5  ;;  %v990_v17 = vld [vmem:[%s2166_s1 + $0xf0] sm:$0xff] }
   0xf   :  { %v178_v16 = vrot.slane %v989_v59, %v1155_v6  ;;  %v991_v18 = vld [vmem:[%s2166_s1 + $0xf8] sm:$0xff]  ;;  %v207_v19 = vrot.slane %v996_v2, %v1151_v4  ;;  %v1325_v20 = vmul.f32 %v980_v57, %v137_v51  ;;  %v1327_v21 = vmul.f32 %v981_v58, %v141_v52  ;;  %v992_v36 = vld [vmem:[%s2166_s1 + $0x100] sm:$0xff]  ;;  %v993_v37 = vld [vmem:[%s2166_s1 + $0x108] sm:$0xff] }
  0x10   :  { %v211_v22 = vrot.slane %v996_v2, %v1153_v5  ;;  %v215_v23 = vrot.slane %v996_v2, %v1155_v6  ;;  %v182_v24 = vmul.f32 %v983_v0, %v170_v14  ;;  %v183_v29 = vmul.f32 %v984_v1, %v174_v15  ;;  %v994_v40 = vld [vmem:[%s2166_s1 + $0x110] sm:$0xff]  ;;  %v995_v41 = vld [vmem:[%s2166_s1 + $0x118] sm:$0xff]  ;;  %v1001_v1 = vld [vmem:[%s2166_s1 + $0x140] sm:$0xff] }
  0x11   :  { %v184_v30 = vmul.f32 %v985_v10, %v178_v16  ;;  %v185_v31 = vmul.f32 %v986_v11, %v170_v14  ;;  %v186_v38 = vmul.f32 %v987_v12, %v174_v15  ;;  %v187_v39 = vmul.f32 %v988_v13, %v178_v16  ;;  %v1003_v50 = vld [vmem:[%s2165_s0 + $0x6] ss:$8 sm:$0x7]  ;;  %v1000_v0 = vld [vmem:[%s2166_s1 + $0x138] sm:$0xff] }
  0x12   :  { %v219_v42 = vmul.f32 %v990_v17, %v207_v19  ;;  %v220_v43 = vmul.f32 %v991_v18, %v211_v22  ;;  %v1344_v44 = vadd.f32 %v182_v24, %v1199_v25  ;;  %v1347_v45 = vadd.f32 %v183_v29, %v1201_v26  ;;  %v997_v26 = vld [vmem:[%s2166_s1 + $0x120] sm:$0xff]  ;;  %v1002_v10 = vld [vmem:[%s2166_s1 + $0x148] sm:$0xff]  ;;  %v1008_v29 = vld [vmem:[%s2166_s1 + $0x170] sm:$0xff] }
  0x13   :  { %v1350_v48 = vadd.f32 %v184_v30, %v1203_v27  ;;  %v1353_v49 = vadd.f32 %v185_v31, %v1205_v28  ;;  %v1359_v51 = vadd.f32 %v186_v38, %v1216_v32  ;;  %v1362_v52 = vadd.f32 %v187_v39, %v1218_v33  ;;  %v1010_v27 = vld [vmem:[%s2165_s0 + $0x7] ss:$8 sm:$0x7]  ;;  %v1009_v30 = vld [vmem:[%s2166_s1 + $0x178] sm:$0xff] }
  0x14   :  { %v221_v25 = vmul.f32 %v992_v36, %v215_v23  ;;  %v222_v57 = vmul.f32 %v993_v37, %v207_v19  ;;  %v223_v28 = vmul.f32 %v994_v40, %v211_v22  ;;  %v224_v58 = vmul.f32 %v995_v41, %v215_v23  ;;  %v998_v33 = vld [vmem:[%s2166_s1 + $0x128] sm:$0xff]  ;;  %v1004_v19 = vld [vmem:[%s2166_s1 + $0x150] sm:$0xff] }
  0x15   :  { %v1371_v59 = vadd.f32 %v219_v42, %v1220_v34  ;;  %v1374_v32 = vadd.f32 %v220_v43, %v1222_v35  ;;  %v999_v35 = vld [vmem:[%s2166_s1 + $0x130] sm:$0xff]  ;;  %v244_v11 = vrot.slane %v1003_v50, %v1151_v4  ;;  %v248_v12 = vrot.slane %v1003_v50, %v1153_v5  ;;  %v1007_v24 = vld [vmem:[%s2166_s1 + $0x168] sm:$0xff] }
  0x16   :  { %v1386_v2 = vadd.f32 %v221_v25, %v1246_v46  ;;  %v1389_v34 = vadd.f32 %v222_v57, %v1248_v47  ;;  %v1400_v13 = vadd.f32 %v223_v28, %v1261_v53  ;;  %v1403_v46 = vadd.f32 %v224_v58, %v1263_v54  ;;  %v1005_v53 = vld [vmem:[%s2166_s1 + $0x158] sm:$0xff]  ;;  %v1006_v54 = vld [vmem:[%s2166_s1 + $0x160] sm:$0xff] }
  0x17   :  { %v252_v47 = vrot.slane %v1003_v50, %v1155_v6  ;;  %v281_v14 = vrot.slane %v1010_v27, %v1151_v4  ;;  %v256_v15 = vmul.f32 %v997_v26, %v244_v11  ;;  %v257_v16 = vmul.f32 %v998_v33, %v248_v12  ;;  %v1017_v41 = vld [vmem:[%s2165_s0 + $0x18] ss:$8 sm:$0x7] }
  0x18   :  { %v259_v17 = vmul.f32 %v1000_v0, %v244_v11  ;;  %v260_v18 = vmul.f32 %v1001_v1, %v248_v12  ;;  %v285_v31 = vrot.slane %v1010_v27, %v1153_v5  ;;  %v289_v36 = vrot.slane %v1010_v27, %v1155_v6  ;;  %v1012_v26 = vld [vmem:[%s2166_s1 + $0x188] sm:$0xff]  ;;  %v1015_v28 = vld [vmem:[%s2166_s1 + $0x1a0] sm:$0xff] }
  0x19   :  { %v258_v22 = vmul.f32 %v999_v35, %v252_v47  ;;  %v261_v23 = vmul.f32 %v1002_v10, %v252_v47  ;;  %v1428_v37 = vadd.f32 %v256_v15, %v1265_v55  ;;  %v1431_v38 = vadd.f32 %v257_v16, %v1267_v56  ;;  %v1024_v0 = vld [vmem:[%s2165_s0 + $0x19] ss:$8 sm:$0x7]  ;;  %v1013_v10 = vld [vmem:[%s2166_s1 + $0x190] sm:$0xff] }
  0x1a   :  { %v1434_v39 = vadd.f32 %v259_v17, %v1280_v61  ;;  %v1437_v40 = vadd.f32 %v260_v18, %v1282_v62  ;;  %v293_v55 = vmul.f32 %v1004_v19, %v281_v14  ;;  %v294_v50 = vmul.f32 %v1005_v53, %v285_v31  ;;  %v1011_v62 = vld [vmem:[%s2166_s1 + $0x180] sm:$0xff]  ;;  %v1016_v11 = vld [vmem:[%s2166_s1 + $0x1a8] sm:$0xff] }
  0x1b   :  { %v1443_v42 = vadd.f32 %v258_v22, %v1278_v60  ;;  %v1446_v43 = vadd.f32 %v261_v23, %v1284_v63  ;;  %v295_v56 = vmul.f32 %v1006_v54, %v289_v36  ;;  %v296_v25 = vmul.f32 %v1007_v24, %v281_v14  ;;  %v1014_v60 = vld [vmem:[%s2166_s1 + $0x198] sm:$0xff]  ;;  %v1020_v15 = vld [vmem:[%s2166_s1 + $0x1c0] sm:$0xff]  ;;  %v1021_v16 = vld [vmem:[%s2166_s1 + $0x1c8] sm:$0xff] }
  0x1c   :  { %v297_v57 = vmul.f32 %v1008_v29, %v285_v31  ;;  %v298_v61 = vmul.f32 %v1009_v30, %v289_v36  ;;  %v1458_v63 = vadd.f32 %v293_v55, %v1295_v3  ;;  %v1461_v27 = vadd.f32 %v294_v50, %v1297_v7  ;;  %v1022_v24 = vld [vmem:[%s2166_s1 + $0x1d0] sm:$0xff]  ;;  %v1023_v29 = vld [vmem:[%s2166_s1 + $0x1d8] sm:$0xff] }
  0x1d   :  { %v318_v58 = vrot.slane %v1017_v41, %v1151_v4  ;;  %v322_v33 = vrot.slane %v1017_v41, %v1153_v5  ;;  %v1472_v1 = vadd.f32 %v295_v56, %v1299_v8  ;;  %v1475_v3 = vadd.f32 %v296_v25, %v1301_v9 }
  0x1e   :  { %v1478_v7 = vadd.f32 %v297_v57, %v1325_v20  ;;  %v1481_v35 = vadd.f32 %v298_v61, %v1327_v21  ;;  %v326_v8 = vrot.slane %v1017_v41, %v1155_v6  ;;  %v1018_v20 = vld [vmem:[%s2166_s1 + $0x1b0] sm:$0xff]  ;;  %v1019_v21 = vld [vmem:[%s2166_s1 + $0x1b8] sm:$0xff]  ;;  %v355_v17 = vrot.slane %v1024_v0, %v1151_v4 }
  0x1f   :  { %v330_v12 = vmul.f32 %v1011_v62, %v318_v58  ;;  %v331_v47 = vmul.f32 %v1012_v26, %v322_v33  ;;  %v333_v9 = vmul.f32 %v1014_v60, %v318_v58  ;;  %v334_v14 = vmul.f32 %v1015_v28, %v322_v33  ;;  %v1028_v62 = vld [vmem:[%s2166_s1 + $0x1f8] sm:$0xff]  ;;  %v1029_v26 = vld [vmem:[%s2166_s1 + $0x200] sm:$0xff]  ;;  %v1030_v28 = vld [vmem:[%s2166_s1 + $0x208] sm:$0xff] }
  0x20   :  { %v359_v18 = vrot.slane %v1024_v0, %v1153_v5  ;;  %v363_v19 = vrot.slane %v1024_v0, %v1155_v6  ;;  %v332_v53 = vmul.f32 %v1013_v10, %v326_v8  ;;  %v335_v54 = vmul.f32 %v1016_v11, %v326_v8 }
  0x21   :  { %v1506_v22 = vadd.f32 %v330_v12, %v1344_v44  ;;  %v1509_v23 = vadd.f32 %v331_v47, %v1347_v45  ;;  %v1518_v30 = vadd.f32 %v333_v9, %v1353_v49  ;;  %v1521_v31 = vadd.f32 %v334_v14, %v1359_v51  ;;  %v1031_v45 = vld [vmem:[%s2165_s0 + $0x1a] ss:$8 sm:$0x7]  ;;  %v1038_v51 = vld [vmem:[%s2165_s0 + $0x1b] ss:$8 sm:$0x7] }
  0x22   :  { %v367_v36 = vmul.f32 %v1018_v20, %v355_v17  ;;  %v368_v44 = vmul.f32 %v1019_v21, %v359_v18  ;;  %v1527_v41 = vadd.f32 %v332_v53, %v1350_v48  ;;  %v1530_v55 = vadd.f32 %v335_v54, %v1362_v52  ;;  %v1025_v49 = vld [vmem:[%s2166_s1 + $0x1e0] sm:$0xff]  ;;  %v1026_v52 = vld [vmem:[%s2166_s1 + $0x1e8] sm:$0xff]  ;;  %v1032_v9 = vld [vmem:[%s2166_s1 + $0x210] sm:$0xff] }
  0x23   :  { %v369_v50 = vmul.f32 %v1020_v15, %v363_v19  ;;  %v370_v56 = vmul.f32 %v1021_v16, %v355_v17  ;;  %v371_v25 = vmul.f32 %v1022_v24, %v359_v18  ;;  %v372_v57 = vmul.f32 %v1023_v29, %v363_v19  ;;  %v1035_v14 = vld [vmem:[%s2166_s1 + $0x228] sm:$0xff]  ;;  %v1036_v15 = vld [vmem:[%s2166_s1 + $0x230] sm:$0xff]  ;;  %v1037_v16 = vld [vmem:[%s2166_s1 + $0x238] sm:$0xff] }
  0x24   :  { %v1539_v61 = vadd.f32 %v367_v36, %v1371_v59  ;;  %v1542_v48 = vadd.f32 %v368_v44, %v1374_v32  ;;  %v1027_v32 = vld [vmem:[%s2166_s1 + $0x1f0] sm:$0xff]  ;;  %v392_v58 = vrot.slane %v1031_v45, %v1151_v4  ;;  %v396_v33 = vrot.slane %v1031_v45, %v1153_v5  ;;  %v1045_v29 = vld [vmem:[%s2165_s0 + $0x1c] ss:$8 sm:$0x7] }
  0x25   :  { %v1554_v60 = vadd.f32 %v369_v50, %v1386_v2  ;;  %v1557_v59 = vadd.f32 %v370_v56, %v1389_v34  ;;  %v1568_v0 = vadd.f32 %v371_v25, %v1400_v13  ;;  %v1571_v2 = vadd.f32 %v372_v57, %v1403_v46  ;;  %v1033_v13 = vld [vmem:[%s2166_s1 + $0x218] sm:$0xff]  ;;  %v1034_v46 = vld [vmem:[%s2166_s1 + $0x220] sm:$0xff] }
  0x26   :  { %v400_v34 = vrot.slane %v1031_v45, %v1155_v6  ;;  %v429_v10 = vrot.slane %v1038_v51, %v1151_v4  ;;  %v404_v11 = vmul.f32 %v1025_v49, %v392_v58  ;;  %v405_v8 = vmul.f32 %v1026_v52, %v396_v33  ;;  %v1040_v49 = vld [vmem:[%s2166_s1 + $0x248] sm:$0xff]  ;;  %v1043_v25 = vld [vmem:[%s2166_s1 + $0x260] sm:$0xff] }
  0x27   :  { %v407_v12 = vmul.f32 %v1028_v62, %v392_v58  ;;  %v408_v47 = vmul.f32 %v1029_v26, %v396_v33  ;;  %v433_v17 = vrot.slane %v1038_v51, %v1153_v5  ;;  %v437_v18 = vrot.slane %v1038_v51, %v1155_v6  ;;  %v1052_v62 = vld [vmem:[%s2165_s0 + $0x1d] ss:$8 sm:$0x7] }
  0x28   :  { %v406_v20 = vmul.f32 %v1027_v32, %v400_v34  ;;  %v409_v21 = vmul.f32 %v1030_v28, %v400_v34  ;;  %v1596_v19 = vadd.f32 %v404_v11, %v1428_v37  ;;  %v1599_v53 = vadd.f32 %v405_v8, %v1431_v38  ;;  %v1041_v28 = vld [vmem:[%s2166_s1 + $0x250] sm:$0xff]  ;;  %v1044_v58 = vld [vmem:[%s2166_s1 + $0x268] sm:$0xff]  ;;  %v1048_v11 = vld [vmem:[%s2166_s1 + $0x280] sm:$0xff] }
  0x29   :  { %v1602_v54 = vadd.f32 %v407_v12, %v1434_v39  ;;  %v1605_v24 = vadd.f32 %v408_v47, %v1437_v40  ;;  %v441_v37 = vmul.f32 %v1032_v9, %v429_v10  ;;  %v442_v45 = vmul.f32 %v1033_v13, %v433_v17  ;;  %v1039_v40 = vld [vmem:[%s2166_s1 + $0x240] sm:$0xff]  ;;  %v1049_v8 = vld [vmem:[%s2166_s1 + $0x288] sm:$0xff] }
  0x2a   :  { %v1611_v36 = vadd.f32 %v406_v20, %v1443_v42  ;;  %v1614_v44 = vadd.f32 %v409_v21, %v1446_v43  ;;  %v443_v38 = vmul.f32 %v1034_v46, %v437_v18  ;;  %v444_v50 = vmul.f32 %v1035_v14, %v429_v10  ;;  %v1042_v42 = vld [vmem:[%s2166_s1 + $0x258] sm:$0xff]  ;;  %v1050_v14 = vld [vmem:[%s2166_s1 + $0x290] sm:$0xff] }
  0x2b   :  { %v445_v56 = vmul.f32 %v1036_v15, %v433_v17  ;;  %v446_v39 = vmul.f32 %v1037_v16, %v437_v18  ;;  %v1626_v43 = vadd.f32 %v441_v37, %v1458_v63  ;;  %v1629_v51 = vadd.f32 %v442_v45, %v1461_v27  ;;  %v1051_v15 = vld [vmem:[%s2166_s1 + $0x298] sm:$0xff] }
  0x2c   :  { %v466_v57 = vrot.slane %v1045_v29, %v1151_v4  ;;  %v470_v52 = vrot.slane %v1045_v29, %v1153_v5  ;;  %v1640_v26 = vadd.f32 %v443_v38, %v1472_v1  ;;  %v1643_v63 = vadd.f32 %v444_v50, %v1475_v3 }
  0x2d   :  { %v1646_v27 = vadd.f32 %v445_v56, %v1478_v7  ;;  %v1649_v32 = vadd.f32 %v446_v39, %v1481_v35  ;;  %v474_v1 = vrot.slane %v1045_v29, %v1155_v6  ;;  %v1046_v7 = vld [vmem:[%s2166_s1 + $0x270] sm:$0xff]  ;;  %v1047_v35 = vld [vmem:[%s2166_s1 + $0x278] sm:$0xff]  ;;  %v503_v12 = vrot.slane %v1052_v62, %v1151_v4 }
  0x2e   :  { %v478_v33 = vmul.f32 %v1039_v40, %v466_v57  ;;  %v479_v34 = vmul.f32 %v1040_v49, %v470_v52  ;;  %v481_v3 = vmul.f32 %v1042_v42, %v466_v57  ;;  %v482_v10 = vmul.f32 %v1043_v25, %v470_v52  ;;  %v1056_v40 = vld [vmem:[%s2166_s1 + $0x2b8] sm:$0xff]  ;;  %v1057_v49 = vld [vmem:[%s2166_s1 + $0x2c0] sm:$0xff]  ;;  %v1058_v25 = vld [vmem:[%s2166_s1 + $0x2c8] sm:$0xff] }
  0x2f   :  { %v507_v47 = vrot.slane %v1052_v62, %v1153_v5  ;;  %v511_v9 = vrot.slane %v1052_v62, %v1155_v6  ;;  %v480_v13 = vmul.f32 %v1041_v28, %v474_v1  ;;  %v483_v46 = vmul.f32 %v1044_v58, %v474_v1 }
  0x30   :  { %v1674_v20 = vadd.f32 %v478_v33, %v1506_v22  ;;  %v1677_v21 = vadd.f32 %v479_v34, %v1509_v23  ;;  %v1686_v16 = vadd.f32 %v481_v3, %v1518_v30  ;;  %v1689_v17 = vadd.f32 %v482_v10, %v1521_v31  ;;  %v1059_v23 = vld [vmem:[%s2165_s0 + $0x1e] ss:$8 sm:$0x7]  ;;  %v1066_v31 = vld [vmem:[%s2165_s0 + $0x1f] ss:$8 sm:$0x7] }
  0x31   :  { %v515_v18 = vmul.f32 %v1046_v7, %v503_v12  ;;  %v516_v22 = vmul.f32 %v1047_v35, %v507_v47  ;;  %v1695_v29 = vadd.f32 %v480_v13, %v1527_v41  ;;  %v1698_v37 = vadd.f32 %v483_v46, %v1530_v55  ;;  %v1053_v30 = vld [vmem:[%s2166_s1 + $0x2a0] sm:$0xff]  ;;  %v1054_v55 = vld [vmem:[%s2166_s1 + $0x2a8] sm:$0xff]  ;;  %v1060_v3 = vld [vmem:[%s2166_s1 + $0x2d0] sm:$0xff] }
  0x32   :  { %v517_v45 = vmul.f32 %v1048_v11, %v511_v9  ;;  %v518_v38 = vmul.f32 %v1049_v8, %v503_v12  ;;  %v519_v50 = vmul.f32 %v1050_v14, %v507_v47  ;;  %v520_v56 = vmul.f32 %v1051_v15, %v511_v9  ;;  %v1063_v10 = vld [vmem:[%s2166_s1 + $0x2e8] sm:$0xff]  ;;  %v1064_v11 = vld [vmem:[%s2166_s1 + $0x2f0] sm:$0xff]  ;;  %v1065_v8 = vld [vmem:[%s2166_s1 + $0x2f8] sm:$0xff] }
  0x33   :  { %v1707_v39 = vadd.f32 %v515_v18, %v1539_v61  ;;  %v1710_v41 = vadd.f32 %v516_v22, %v1542_v48  ;;  %v1055_v48 = vld [vmem:[%s2166_s1 + $0x2b0] sm:$0xff]  ;;  %v540_v57 = vrot.slane %v1059_v23, %v1151_v4  ;;  %v544_v52 = vrot.slane %v1059_v23, %v1153_v5 }
  0x34   :  { %v1722_v42 = vadd.f32 %v517_v45, %v1554_v60  ;;  %v1725_v61 = vadd.f32 %v518_v38, %v1557_v59  ;;  %v1736_v62 = vadd.f32 %v519_v50, %v1568_v0  ;;  %v1739_v60 = vadd.f32 %v520_v56, %v1571_v2  ;;  %v1061_v0 = vld [vmem:[%s2166_s1 + $0x2d8] sm:$0xff]  ;;  %v1062_v2 = vld [vmem:[%s2166_s1 + $0x2e0] sm:$0xff] }
  0x35   :  { %v548_v59 = vrot.slane %v1059_v23, %v1155_v6  ;;  %v577_v28 = vrot.slane %v1066_v31, %v1151_v4  ;;  %v552_v58 = vmul.f32 %v1053_v30, %v540_v57  ;;  %v553_v1 = vmul.f32 %v1054_v55, %v544_v52  ;;  %v1073_v15 = vld [vmem:[%s2165_s0 + $0x30] ss:$8 sm:$0x7]  ;;  %v1068_v30 = vld [vmem:[%s2166_s1 + $0x308] sm:$0xff] }
  0x36   :  { %v555_v33 = vmul.f32 %v1056_v40, %v540_v57  ;;  %v556_v34 = vmul.f32 %v1057_v49, %v544_v52  ;;  %v581_v12 = vrot.slane %v1066_v31, %v1153_v5  ;;  %v585_v47 = vrot.slane %v1066_v31, %v1155_v6  ;;  %v1071_v50 = vld [vmem:[%s2166_s1 + $0x320] sm:$0xff]  ;;  %v1072_v57 = vld [vmem:[%s2166_s1 + $0x328] sm:$0xff] }
  0x37   :  { %v554_v7 = vmul.f32 %v1055_v48, %v548_v59  ;;  %v557_v35 = vmul.f32 %v1058_v25, %v548_v59  ;;  %v1764_v9 = vadd.f32 %v552_v58, %v1596_v19  ;;  %v1767_v13 = vadd.f32 %v553_v1, %v1599_v53  ;;  %v1080_v40 = vld [vmem:[%s2165_s0 + $0x31] ss:$8 sm:$0x7]  ;;  %v1077_v1 = vld [vmem:[%s2166_s1 + $0x348] sm:$0xff] }
  0x38   :  { %v1770_v46 = vadd.f32 %v555_v33, %v1602_v54  ;;  %v1773_v14 = vadd.f32 %v556_v34, %v1605_v24  ;;  %v589_v19 = vmul.f32 %v1060_v3, %v577_v28  ;;  %v590_v23 = vmul.f32 %v1061_v0, %v581_v12  ;;  %v1067_v24 = vld [vmem:[%s2166_s1 + $0x300] sm:$0xff]  ;;  %v1069_v25 = vld [vmem:[%s2166_s1 + $0x310] sm:$0xff] }
  0x39   :  { %v1779_v18 = vadd.f32 %v554_v7, %v1611_v36  ;;  %v1782_v22 = vadd.f32 %v557_v35, %v1614_v44  ;;  %v591_v53 = vmul.f32 %v1062_v2, %v585_v47  ;;  %v592_v45 = vmul.f32 %v1063_v10, %v577_v28  ;;  %v1070_v36 = vld [vmem:[%s2166_s1 + $0x318] sm:$0xff]  ;;  %v1076_v58 = vld [vmem:[%s2166_s1 + $0x340] sm:$0xff]  ;;  %v1078_v10 = vld [vmem:[%s2166_s1 + $0x350] sm:$0xff] }
  0x3a   :  { %v593_v38 = vmul.f32 %v1064_v11, %v581_v12  ;;  %v594_v54 = vmul.f32 %v1065_v8, %v585_v47  ;;  %v1794_v44 = vadd.f32 %v589_v19, %v1626_v43  ;;  %v1797_v31 = vadd.f32 %v590_v23, %v1629_v51  ;;  %v1079_v11 = vld [vmem:[%s2166_s1 + $0x358] sm:$0xff] }
  0x3b   :  { %v614_v56 = vrot.slane %v1073_v15, %v1151_v4  ;;  %v618_v55 = vrot.slane %v1073_v15, %v1153_v5  ;;  %v1808_v49 = vadd.f32 %v591_v53, %v1640_v26  ;;  %v1811_v43 = vadd.f32 %v592_v45, %v1643_v63 }
  0x3c   :  { %v1814_v51 = vadd.f32 %v593_v38, %v1646_v27  ;;  %v1817_v48 = vadd.f32 %v594_v54, %v1649_v32  ;;  %v622_v26 = vrot.slane %v1073_v15, %v1155_v6  ;;  %v1074_v27 = vld [vmem:[%s2166_s1 + $0x330] sm:$0xff]  ;;  %v1075_v32 = vld [vmem:[%s2166_s1 + $0x338] sm:$0xff]  ;;  %v651_v33 = vrot.slane %v1080_v40, %v1151_v4 }
  0x3d   :  { %v626_v52 = vmul.f32 %v1067_v24, %v614_v56  ;;  %v627_v59 = vmul.f32 %v1068_v30, %v618_v55  ;;  %v629_v63 = vmul.f32 %v1070_v36, %v614_v56  ;;  %v630_v28 = vmul.f32 %v1071_v50, %v618_v55  ;;  %v1084_v24 = vld [vmem:[%s2166_s1 + $0x378] sm:$0xff]  ;;  %v1085_v30 = vld [vmem:[%s2166_s1 + $0x380] sm:$0xff]  ;;  %v1086_v50 = vld [vmem:[%s2166_s1 + $0x388] sm:$0xff] }
  0x3e   :  { %v655_v34 = vrot.slane %v1080_v40, %v1153_v5  ;;  %v659_v3 = vrot.slane %v1080_v40, %v1155_v6  ;;  %v628_v0 = vmul.f32 %v1069_v25, %v622_v26  ;;  %v631_v2 = vmul.f32 %v1072_v57, %v622_v26 }
  0x3f   :  { %v1842_v7 = vadd.f32 %v626_v52, %v1674_v20  ;;  %v1845_v35 = vadd.f32 %v627_v59, %v1677_v21  ;;  %v1854_v8 = vadd.f32 %v629_v63, %v1686_v16  ;;  %v1857_v12 = vadd.f32 %v630_v28, %v1689_v17  ;;  %v1087_v21 = vld [vmem:[%s2165_s0 + $0x32] ss:$8 sm:$0x7]  ;;  %v1094_v17 = vld [vmem:[%s2165_s0 + $0x33] ss:$8 sm:$0x7] }
  0x40   :  { %v663_v47 = vmul.f32 %v1074_v27, %v651_v33  ;;  %v664_v20 = vmul.f32 %v1075_v32, %v655_v34  ;;  %v1863_v15 = vadd.f32 %v628_v0, %v1695_v29  ;;  %v1866_v19 = vadd.f32 %v631_v2, %v1698_v37  ;;  %v1081_v16 = vld [vmem:[%s2166_s1 + $0x360] sm:$0xff]  ;;  %v1082_v37 = vld [vmem:[%s2166_s1 + $0x368] sm:$0xff]  ;;  %v1088_v63 = vld [vmem:[%s2166_s1 + $0x390] sm:$0xff] }
  0x41   :  { %v665_v23 = vmul.f32 %v1076_v58, %v659_v3  ;;  %v666_v53 = vmul.f32 %v1077_v1, %v651_v33  ;;  %v667_v45 = vmul.f32 %v1078_v10, %v655_v34  ;;  %v668_v38 = vmul.f32 %v1079_v11, %v659_v3  ;;  %v1091_v28 = vld [vmem:[%s2166_s1 + $0x3a8] sm:$0xff]  ;;  %v1092_v58 = vld [vmem:[%s2166_s1 + $0x3b0] sm:$0xff]  ;;  %v1093_v1 = vld [vmem:[%s2166_s1 + $0x3b8] sm:$0xff] }
  0x42   :  { %v1875_v54 = vadd.f32 %v663_v47, %v1707_v39  ;;  %v1878_v29 = vadd.f32 %v664_v20, %v1710_v41  ;;  %v1083_v41 = vld [vmem:[%s2166_s1 + $0x370] sm:$0xff]  ;;  %v688_v56 = vrot.slane %v1087_v21, %v1151_v4  ;;  %v692_v55 = vrot.slane %v1087_v21, %v1153_v5 }
  0x43   :  { %v1890_v36 = vadd.f32 %v665_v23, %v1722_v42  ;;  %v1893_v39 = vadd.f32 %v666_v53, %v1725_v61  ;;  %v1904_v40 = vadd.f32 %v667_v45, %v1736_v62  ;;  %v1907_v42 = vadd.f32 %v668_v38, %v1739_v60  ;;  %v1089_v62 = vld [vmem:[%s2166_s1 + $0x398] sm:$0xff]  ;;  %v1090_v60 = vld [vmem:[%s2166_s1 + $0x3a0] sm:$0xff] }
  0x44   :  { %v696_v61 = vrot.slane %v1087_v21, %v1155_v6  ;;  %v725_v25 = vrot.slane %v1094_v17, %v1151_v4  ;;  %v700_v57 = vmul.f32 %v1081_v16, %v688_v56  ;;  %v701_v26 = vmul.f32 %v1082_v37, %v692_v55  ;;  %v1101_v11 = vld [vmem:[%s2165_s0 + $0x34] ss:$8 sm:$0x7]  ;;  %v1096_v16 = vld [vmem:[%s2166_s1 + $0x3c8] sm:$0xff] }
  0x45   :  { %v703_v52 = vmul.f32 %v1084_v24, %v688_v56  ;;  %v704_v59 = vmul.f32 %v1085_v30, %v692_v55  ;;  %v729_v33 = vrot.slane %v1094_v17, %v1153_v5  ;;  %v733_v34 = vrot.slane %v1094_v17, %v1155_v6  ;;  %v1099_v45 = vld [vmem:[%s2166_s1 + $0x3e0] sm:$0xff]  ;;  %v1100_v56 = vld [vmem:[%s2166_s1 + $0x3e8] sm:$0xff] }
  0x46   :  { %v702_v27 = vmul.f32 %v1083_v41, %v696_v61  ;;  %v705_v32 = vmul.f32 %v1086_v50, %v696_v61  ;;  %v1932_v3 = vadd.f32 %v700_v57, %v1764_v9  ;;  %v1935_v0 = vadd.f32 %v701_v26, %v1767_v13  ;;  %v1108_v24 = vld [vmem:[%s2165_s0 + $0x35] ss:$8 sm:$0x7]  ;;  %v1105_v26 = vld [vmem:[%s2166_s1 + $0x408] sm:$0xff] }
  0x47   :  { %v1938_v2 = vadd.f32 %v703_v52, %v1770_v46  ;;  %v1941_v10 = vadd.f32 %v704_v59, %v1773_v14  ;;  %v737_v9 = vmul.f32 %v1088_v63, %v725_v25  ;;  %v738_v21 = vmul.f32 %v1089_v62, %v729_v33  ;;  %v1095_v14 = vld [vmem:[%s2166_s1 + $0x3c0] sm:$0xff]  ;;  %v1097_v50 = vld [vmem:[%s2166_s1 + $0x3d0] sm:$0xff] }
  0x48   :  { %v1947_v47 = vadd.f32 %v702_v27, %v1779_v18  ;;  %v1950_v20 = vadd.f32 %v705_v32, %v1782_v22  ;;  %v739_v13 = vmul.f32 %v1090_v60, %v733_v34  ;;  %v740_v23 = vmul.f32 %v1091_v28, %v725_v25  ;;  %v1098_v18 = vld [vmem:[%s2166_s1 + $0x3d8] sm:$0xff]  ;;  %v1104_v57 = vld [vmem:[%s2166_s1 + $0x400] sm:$0xff]  ;;  %v1106_v28 = vld [vmem:[%s2166_s1 + $0x410] sm:$0xff] }
  0x49   :  { %v741_v53 = vmul.f32 %v1092_v58, %v729_v33  ;;  %v742_v46 = vmul.f32 %v1093_v1, %v733_v34  ;;  %v1962_v22 = vadd.f32 %v737_v9, %v1794_v44  ;;  %v1965_v17 = vadd.f32 %v738_v21, %v1797_v31  ;;  %v1107_v58 = vld [vmem:[%s2166_s1 + $0x418] sm:$0xff] }
  0x4a   :  { %v762_v38 = vrot.slane %v1101_v11, %v1151_v4  ;;  %v766_v37 = vrot.slane %v1101_v11, %v1153_v5  ;;  %v1976_v30 = vadd.f32 %v739_v13, %v1808_v49  ;;  %v1979_v44 = vadd.f32 %v740_v23, %v1811_v43 }
  0x4b   :  { %v1982_v31 = vadd.f32 %v741_v53, %v1814_v51  ;;  %v1985_v41 = vadd.f32 %v742_v46, %v1817_v48  ;;  %v770_v49 = vrot.slane %v1101_v11, %v1155_v6  ;;  %v1102_v51 = vld [vmem:[%s2166_s1 + $0x3f0] sm:$0xff]  ;;  %v1103_v48 = vld [vmem:[%s2166_s1 + $0x3f8] sm:$0xff]  ;;  %v799_v52 = vrot.slane %v1108_v24, %v1151_v4 }
  0x4c   :  { %v774_v55 = vmul.f32 %v1095_v14, %v762_v38  ;;  %v775_v61 = vmul.f32 %v1096_v16, %v766_v37  ;;  %v777_v43 = vmul.f32 %v1098_v18, %v762_v38  ;;  %v778_v25 = vmul.f32 %v1099_v45, %v766_v37  ;;  %v1112_v14 = vld [vmem:[%s2166_s1 + $0x438] sm:$0xff]  ;;  %v1113_v16 = vld [vmem:[%s2166_s1 + $0x440] sm:$0xff]  ;;  %v1114_v45 = vld [vmem:[%s2166_s1 + $0x448] sm:$0xff] }
  0x4d   :  { %v803_v59 = vrot.slane %v1108_v24, %v1153_v5  ;;  %v807_v63 = vrot.slane %v1108_v24, %v1155_v6  ;;  %v776_v62 = vmul.f32 %v1097_v50, %v770_v49  ;;  %v779_v60 = vmul.f32 %v1100_v56, %v770_v49 }
  0x4e   :  { %v2010_v27 = vadd.f32 %v774_v55, %v1842_v7  ;;  %v2013_v32 = vadd.f32 %v775_v61, %v1845_v35  ;;  %v2022_v1 = vadd.f32 %v777_v43, %v1854_v8  ;;  %v2025_v33 = vadd.f32 %v778_v25, %v1857_v12  ;;  %v1115_v35 = vld [vmem:[%s2165_s0 + $0x36] ss:$8 sm:$0x7]  ;;  %v1122_v12 = vld [vmem:[%s2165_s0 + $0x37] ss:$8 sm:$0x7] }
  0x4f   :  { %v811_v34 = vmul.f32 %v1102_v51, %v799_v52  ;;  %v812_v7 = vmul.f32 %v1103_v48, %v803_v59  ;;  %v2031_v11 = vadd.f32 %v776_v62, %v1863_v15  ;;  %v2034_v9 = vadd.f32 %v779_v60, %v1866_v19  ;;  %v1109_v8 = vld [vmem:[%s2166_s1 + $0x420] sm:$0xff]  ;;  %v1110_v19 = vld [vmem:[%s2166_s1 + $0x428] sm:$0xff]  ;;  %v1116_v43 = vld [vmem:[%s2166_s1 + $0x450] sm:$0xff] }
  0x50   :  { %v813_v21 = vmul.f32 %v1104_v57, %v807_v63  ;;  %v814_v13 = vmul.f32 %v1105_v26, %v799_v52  ;;  %v815_v23 = vmul.f32 %v1106_v28, %v803_v59  ;;  %v816_v53 = vmul.f32 %v1107_v58, %v807_v63  ;;  %v1119_v25 = vld [vmem:[%s2166_s1 + $0x468] sm:$0xff]  ;;  %v1120_v57 = vld [vmem:[%s2166_s1 + $0x470] sm:$0xff]  ;;  %v1121_v26 = vld [vmem:[%s2166_s1 + $0x478] sm:$0xff] }
  0x51   :  { %v2043_v46 = vadd.f32 %v811_v34, %v1875_v54  ;;  %v2046_v15 = vadd.f32 %v812_v7, %v1878_v29  ;;  %v1111_v29 = vld [vmem:[%s2166_s1 + $0x430] sm:$0xff]  ;;  %v836_v38 = vrot.slane %v1115_v35, %v1151_v4  ;;  %v840_v37 = vrot.slane %v1115_v35, %v1153_v5 }
  0x52   :  { %v2058_v18 = vadd.f32 %v813_v21, %v1890_v36  ;;  %v2061_v54 = vadd.f32 %v814_v13, %v1893_v39  ;;  %v2072_v24 = vadd.f32 %v815_v23, %v1904_v40  ;;  %v2075_v36 = vadd.f32 %v816_v53, %v1907_v42  ;;  %v1117_v40 = vld [vmem:[%s2166_s1 + $0x458] sm:$0xff]  ;;  %v1118_v42 = vld [vmem:[%s2166_s1 + $0x460] sm:$0xff] }
  0x53   :  { %v844_v39 = vrot.slane %v1115_v35, %v1155_v6  ;;  %v873_v50 = vrot.slane %v1122_v12, %v1151_v4  ;;  %v848_v56 = vmul.f32 %v1109_v8, %v836_v38  ;;  %v849_v49 = vmul.f32 %v1110_v19, %v840_v37  ;;  %v1129_v58 = vld [vmem:[%s2165_s0 + $0x48] ss:$8 sm:$0x7]  ;;  %v1127_v23 = vld [vmem:[%s2166_s1 + $0x4a0] sm:$0xff] }
  0x54   :  { %v851_v55 = vmul.f32 %v1112_v14, %v836_v38  ;;  %v852_v61 = vmul.f32 %v1113_v16, %v840_v37  ;;  %v877_v52 = vrot.slane %v1122_v12, %v1153_v5  ;;  %v881_v59 = vrot.slane %v1122_v12, %v1155_v6 }
  0x55   :  { %v850_v51 = vmul.f32 %v1111_v29, %v844_v39  ;;  %v853_v48 = vmul.f32 %v1114_v45, %v844_v39  ;;  %v854_v63 = vadd.f32 %v848_v56, %v1932_v3  ;;  %v855_v62 = vadd.f32 %v849_v49, %v1935_v0  ;;  %v1123_v0 = vld [vmem:[%s2166_s1 + $0x480] sm:$0xff] }
  0x56   :  { %v857_v60 = vadd.f32 %v851_v55, %v1938_v2  ;;  %v858_v28 = vadd.f32 %v852_v61, %v1941_v10  ;;  %v885_v35 = vmul.f32 %v1116_v43, %v873_v50  ;;  %v886_v21 = vmul.f32 %v1117_v40, %v877_v52  ;;  %v1124_v2 = vld [vmem:[%s2166_s1 + $0x488] sm:$0xff]  ;;  %v1126_v10 = vld [vmem:[%s2166_s1 + $0x498] sm:$0xff] }
  0x57   :  { %v856_v34 = vadd.f32 %v850_v51, %v1947_v47  ;;  %v859_v7 = vadd.f32 %v853_v48, %v1950_v20  ;;  %v887_v13 = vmul.f32 %v1118_v42, %v881_v59  ;;  %v888_v8 = vmul.f32 %v1119_v25, %v873_v50 }
  0x58   :  { %v889_v12 = vmul.f32 %v1120_v57, %v877_v52  ;;  %v890_v3 = vmul.f32 %v1121_v26, %v881_v59  ;;  %v891_v47 = vadd.f32 %v885_v35, %v1962_v22  ;;  %v892_v20 = vadd.f32 %v886_v21, %v1965_v17  ;;  %v1125_v22 = vld [vmem:[%s2166_s1 + $0x490] sm:$0xff]  ;;  %v1128_v17 = vld [vmem:[%s2166_s1 + $0x4a8] sm:$0xff] }
  0x59   :  { %v910_v53 = vrot.slane %v1129_v58, %v1151_v4  ;;  %v914_v19 = vrot.slane %v1129_v58, %v1153_v5  ;;  %v893_v14 = vadd.f32 %v887_v13, %v1976_v30  ;;  %v894_v16 = vadd.f32 %v888_v8, %v1979_v44 }
  0x5a   :  { %v895_v29 = vadd.f32 %v889_v12, %v1982_v31  ;;  %v896_v45 = vadd.f32 %v890_v3, %v1985_v41  ;;  %v918_v4 = vrot.slane %v1129_v58, %v1155_v6  ;;  %v940_v39 = vadd.f32 %v891_v47, %v854_v63 }
  0x5b   :  { %v922_v38 = vmul.f32 %v1123_v0, %v910_v53  ;;  %v923_v5 = vmul.f32 %v1124_v2, %v914_v19  ;;  %v925_v37 = vmul.f32 %v1126_v10, %v910_v53  ;;  %v926_v30 = vmul.f32 %v1127_v23, %v914_v19 }
  0x5c   :  { %v941_v44 = vadd.f32 %v892_v20, %v855_v62  ;;  %v942_v50 = vadd.f32 %v893_v14, %v856_v34  ;;  %v924_v31 = vmul.f32 %v1125_v22, %v918_v4  ;;  %v927_v56 = vmul.f32 %v1128_v17, %v918_v4 }
  0x5d   :  { %v928_v41 = vadd.f32 %v922_v38, %v2010_v27  ;;  %v929_v49 = vadd.f32 %v923_v5, %v2013_v32  ;;  %v931_v55 = vadd.f32 %v925_v37, %v2022_v1  ;;  %v932_v61 = vadd.f32 %v926_v30, %v2025_v33 }
  0x5e   :  { %v943_v43 = vadd.f32 %v894_v16, %v857_v60  ;;  %v944_v40 = vadd.f32 %v895_v29, %v858_v28  ;;  %v930_v6 = vadd.f32 %v924_v31, %v2031_v11  ;;  %v933_v42 = vadd.f32 %v927_v56, %v2034_v9 }
  0x5f   :  { %v934_v51 = vadd.f32 %v928_v41, %v2043_v46  ;;  %v935_v48 = vadd.f32 %v929_v49, %v2046_v15  ;;  %v937_v25 = vadd.f32 %v931_v55, %v2061_v54  ;;  %v938_v27 = vadd.f32 %v932_v61, %v2072_v24 }
  0x60   :  { %v945_v57 = vadd.f32 %v896_v45, %v859_v7  ;;  %v936_v32 = vadd.f32 %v930_v6, %v2058_v18  ;;  %v939_v1 = vadd.f32 %v933_v42, %v2075_v36 }
  0x61   :  { %v946_v33 = vadd.f32 %v940_v39, %v934_v51  ;;  %v947_v26 = vadd.f32 %v941_v44, %v935_v48  ;;  %v949_v52 = vadd.f32 %v943_v43, %v937_v25  ;;  %v950_v59 = vadd.f32 %v944_v40, %v938_v27 }
  0x62   :  { %v948_v11 = vadd.f32 %v942_v50, %v936_v32  ;;  %v951_v63 = vadd.f32 %v945_v57, %v939_v1 }
  0x63   :  { %952 = vst [vmem:[%s2167_s2] sm:$0xff] %v946_v33  ;;  %953 = vst [vmem:[%s2167_s2 + $0x8] sm:$0xff] %v947_v26 }
  0x64   :  { %955 = vst [vmem:[%s2167_s2 + $0x18] sm:$0xff] %v949_v52  ;;  %956 = vst [vmem:[%s2167_s2 + $0x20] sm:$0xff] %v950_v59 }
  0x65   :  { %954 = vst [vmem:[%s2167_s2 + $0x10] sm:$0xff] %v948_v11  ;;  %957 = vst [vmem:[%s2167_s2 + $0x28] sm:$0xff] %v951_v63 }

</bundles_post_ra>
